<compile_context>
chip_gen: v5e
topology: v5e:2x2
jax: 0.10.0
libtpu: 0.0.40
codegen_flags: <defaults>
</compile_context>

<pallas_src>
import numpy as np

import jax
import jax.numpy as jnp
from jax import lax
from jax.experimental import pallas as pl
from jax.experimental.pallas import tpu as pltpu


# ----------------------------- upsample matrix (constant) -----------------------------

def _upsample_matrix_1d(n):
    """(2n, n) matrix of the scale-2 bilinear upsample (align_corners=False, edge clamp):
       out[2i]   = 0.25*x[max(i-1,0)] + 0.75*x[i]
       out[2i+1] = 0.75*x[i]          + 0.25*x[min(i+1,n-1)]"""
    m = np.zeros((2 * n, n), dtype=np.float32)
    for i in range(n):
        m[2 * i, i] += 0.75
        m[2 * i, max(i - 1, 0)] += 0.25
        m[2 * i + 1, i] += 0.75
        m[2 * i + 1, min(i + 1, n - 1)] += 0.25
    return m


def _upsample_matrix_2d(h, w):
    """(h*w, 2h*2w): flattened low-res image -> flattened x2-upsampled image, so the
    whole bilinear upsample is a single in-kernel MXU matmul with lane-dense output."""
    uh = _upsample_matrix_1d(h)                     # (H, h)
    uw = _upsample_matrix_1d(w)                     # (W, w)
    u = np.einsum("Ii,Jj->ijIJ", uh, uw).reshape(h * w, 4 * h * w)
    return jnp.asarray(u, dtype=jnp.float32)


# ------------------------------------- kernel ------------------------------------------

def _make_kernel(nb, Cx, Cs, W, HW):
    """Fused: upsample-matmul -> concat -> flattened zero-pad im2col -> GEMM -> bias
    -> LeakyReLU.  nb = batch images folded into the GEMM lane axis per grid step."""
    Cin = Cx + Cs

    def kernel(x_ref, s_ref, u_ref, w_ref, b_ref, o_ref):
        # x_ref: (nb, Cx, h*w) f32   s_ref: (nb, Cs, HW) f32   u_ref: (h*w, HW) f32
        # w_ref: (Cout, 9*Cin) bf16  b_ref: (Cout, 1) f32      o_ref: (nb, Cout, HW) f32

        # Column-edge masks generated in-kernel (no extra input / DMA): taps with
        # kj-1 = -1/+1 must not read the wrapped neighbour row of the flattened image.
        colid = lax.broadcasted_iota(jnp.int32, (1, HW), 1) % W
        mask_l = colid != 0                    # zero the kj==0 tap where out-col == 0
        mask_r = colid != (W - 1)              # zero the kj==2 tap where out-col == W-1

        zpad = jnp.zeros((Cin, W + 1), dtype=jnp.float32)

        cols_nb = []
        for b in range(nb):
            # Fused bilinear x2 upsample: one tiny MXU matmul, f32 accumulation,
            # result is already the flattened (Cx, HW) high-res image.
            x_up = jnp.dot(x_ref[b], u_ref[...], preferred_element_type=jnp.float32)
            xa = jnp.concatenate([x_up, s_ref[b]], axis=0)      # channel concat (Cin, HW)
            # Zero-pad by W+1 lanes on each side: every 3x3 tap becomes a constant
            # lane shift; vertical out-of-range reads land in the zero pad.
            xp = jnp.concatenate([zpad, xa, zpad], axis=1)      # (Cin, HW + 2W + 2)

            taps = []
            for ki in range(3):
                for kj in range(3):
                    off = (W + 1) + (ki - 1) * W + (kj - 1)
                    xs = xp[:, off:off + HW]                    # shifted view = one tap
                    if kj == 0:
                        xs = jnp.where(mask_l, xs, 0.0)
                    elif kj == 2:
                        xs = jnp.where(mask_r, xs, 0.0)
                    taps.append(xs)
            cols_nb.append(jnp.concatenate(taps, axis=0))       # (9*Cin, HW) f32

        cols = cols_nb[0] if nb == 1 else jnp.concatenate(cols_nb, axis=1)  # (9*Cin, nb*HW)

        # Single lane-dense GEMM: bf16 operands, f32 accumulation.
        acc = jnp.dot(w_ref[...], cols.astype(jnp.bfloat16),
                      preferred_element_type=jnp.float32)       # (Cout, nb*HW)
        acc = acc + b_ref[...]
        y = jnp.maximum(acc, 0.1 * acc)                         # LeakyReLU(0.1)

        for b in range(nb):
            o_ref[b] = y[:, b * HW:(b + 1) * HW].astype(o_ref.dtype)

    return kernel


# ------------------------------------- wrapper ------------------------------------------

def _choose_batch_block(n, hw_out):
    """Fold batch into the GEMM lane axis but keep >=2 grid steps (v7x has 2 TCs) and
    cap lane width so per-step VMEM stays small."""
    if n <= 1:
        return 1
    nb = max(1, n // 2)
    nb = min(nb, max(1, 4096 // hw_out))
    while n % nb:
        nb -= 1
    return nb


def up_light_forward(x_nchw, skp_nchw, weight_oihw, bias_o):
    """Forward pass of up_light (norm=False). Inputs/outputs are NCHW like PyTorch."""
    N, Cx, h, w = x_nchw.shape
    Ns, Cs, H, W = skp_nchw.shape
    assert Ns == N and (H, W) == (2 * h, 2 * w)
    Cin = Cx + Cs
    Cout = weight_oihw.shape[0]
    HW = H * W
    hw = h * w

    nb = _choose_batch_block(N, HW)

    # Activations: free metadata reshapes only (no upsample/concat/pad/cast in XLA).
    xf = x_nchw.reshape(N, Cx, hw)
    sf = skp_nchw.reshape(N, Cs, HW)

    # Parameter-sized constants (negligible; constant-folded for fixed weights).
    u = _upsample_matrix_2d(h, w)                                          # (hw, HW) f32
    # weight[o, c, ki, kj] -> wm[o, (ki*3+kj)*Cin + c]  (matches in-kernel tap order).
    wm = jnp.transpose(weight_oihw, (0, 2, 3, 1)).reshape(Cout, 9 * Cin).astype(jnp.bfloat16)
    bm = bias_o.astype(jnp.float32).reshape(Cout, 1)

    kernel = _make_kernel(nb, Cx, Cs, W, HW)

    out = pl.pallas_call(
        kernel,
        out_shape=jax.ShapeDtypeStruct((N, Cout, HW), jnp.float32),
        grid=(N // nb,),
        in_specs=[
            pl.BlockSpec((nb, Cx, hw), lambda n: (n, 0, 0)),
            pl.BlockSpec((nb, Cs, HW), lambda n: (n, 0, 0)),
            pl.BlockSpec((hw, HW), lambda n: (0, 0)),
            pl.BlockSpec((Cout, 9 * Cin), lambda n: (0, 0)),
            pl.BlockSpec((Cout, 1), lambda n: (0, 0)),
        ],
        out_specs=pl.BlockSpec((nb, Cout, HW), lambda n: (n, 0, 0)),
        compiler_params=pltpu.CompilerParams(
            dimension_semantics=("parallel",),
            vmem_limit_bytes=32 * 1024 * 1024,
        ),
    )(xf, sf, u, wm, bm)

    return out.reshape(N, Cout, H, W)                                      # already NCHW


# ------------------------------------ reference -----------------------------------------

def _bilinear_upsample_x2_nchw(x):
    """Shifted-slice reference of F.interpolate(scale_factor=2, bilinear, align=False)."""
    n, c, h, w = x.shape
    xp = jnp.concatenate([x[:, :, :1, :], x[:, :, :-1, :]], axis=2)
    xn = jnp.concatenate([x[:, :, 1:, :], x[:, :, -1:, :]], axis=2)
    x2 = jnp.stack([0.25 * xp + 0.75 * x, 0.75 * x + 0.25 * xn], axis=3).reshape(n, c, 2 * h, w)
    xp = jnp.concatenate([x2[:, :, :, :1], x2[:, :, :, :-1]], axis=3)
    xn = jnp.concatenate([x2[:, :, :, 1:], x2[:, :, :, -1:]], axis=3)
    return jnp.stack([0.25 * xp + 0.75 * x2, 0.75 * x2 + 0.25 * xn],
                     axis=4).reshape(n, c, 2 * h, 2 * w)


def _reference(x_nchw, skp_nchw, weight_oihw, bias_o):
    """Pure-JAX f32 reference (lax.conv) for correctness check of the kernel path."""
    x_up = _bilinear_upsample_x2_nchw(x_nchw)
    xcat = jnp.concatenate([x_up, skp_nchw], axis=1)
    y = lax.conv_general_dilated(
        xcat, weight_oihw, window_strides=(1, 1), padding=((1, 1), (1, 1)),
        dimension_numbers=("NCHW", "OIHW", "NCHW"))
    y = y + bias_o[None, :, None, None]
    return jnp.where(y >= 0.0, y, 0.1 * y)


if __name__ == "__main__":
    # up_light(inChannels=8, outChannels=4, norm=False)
    # x: (2, 4, 8, 8) NCHW, skpCn: (2, 4, 16, 16) NCHW -> cat channels = 8 = inChannels
    N, Cx, h, w = 2, 4, 8, 8
    Cs, Cout = 4, 4
    Cin = Cx + Cs

    key = jax.random.PRNGKey(0)
    kx, ks, kw, kb = jax.random.split(key, 4)
    x = jax.random.normal(kx, (N, Cx, h, w), dtype=jnp.float32)
    skp = jax.random.normal(ks, (N, Cs, 2 * h, 2 * w), dtype=jnp.float32)
    weight = jax.random.normal(kw, (Cout, Cin, 3, 3), dtype=jnp.float32) * 0.1
    bias = jax.random.normal(kb, (Cout,), dtype=jnp.float32) * 0.1

    fwd = jax.jit(up_light_forward)
    out = jax.block_until_ready(fwd(x, skp, weight, bias))

    ref = _reference(x, skp, weight, bias)
    assert out.shape == (N, Cout, 2 * h, 2 * w)
    # bf16 conv operands with f32 accumulation -> loosened tolerance vs the f32 reference.
    assert jnp.allclose(out, ref, rtol=5e-2, atol=5e-2), "mismatch vs JAX reference"

    print("KERNEL_OK")
</pallas_src>

<mosaic_0001>
module attributes {stable_mosaic.version = 11 : i64} {
  func.func @kernel(%arg0: i32, %arg1: memref<1x4x64xf32, #tpu.memory_space<vmem>>, %arg2: memref<1x4x256xf32, #tpu.memory_space<vmem>>, %arg3: memref<64x256xf32, #tpu.memory_space<vmem>>, %arg4: memref<4x72xbf16, #tpu.memory_space<vmem>>, %arg5: memref<4x1xf32, #tpu.memory_space<vmem>>, %arg6: memref<1x4x256xf32, #tpu.memory_space<vmem>>) attributes {dimension_semantics = [#tpu.dimension_semantics<parallel>], iteration_bounds = array<i64: 2>, scalar_prefetch = 0 : i64, scratch_operands = 0 : i64, tpu.core_type = #tpu.core_type<tc>, window_params = [{transform_indices = @transform_0, window_bounds = array<i64: 1, 4, 64>}, {transform_indices = @transform_1, window_bounds = array<i64: 1, 4, 256>}, {pipeline_mode = #tpu.pipeline_mode<synchronous>, transform_indices = @transform_2, window_bounds = array<i64: 64, 256>}, {pipeline_mode = #tpu.pipeline_mode<synchronous>, transform_indices = @transform_3, window_bounds = array<i64: 4, 72>}, {pipeline_mode = #tpu.pipeline_mode<synchronous>, transform_indices = @transform_4, window_bounds = array<i64: 4, 1>}, {transform_indices = @transform_5, window_bounds = array<i64: 1, 4, 256>}]} {
    %0 = tpu.iota {dimensions = array<i32: 1>} : vector<1x256xi32>
    %c16_i32 = arith.constant 16 : i32
    %c0_i32 = arith.constant 0 : i32
    %1 = arith.cmpi eq, %c16_i32, %c0_i32 : i32
    %c1_i32 = arith.constant 1 : i32
    %2 = arith.select %1, %c1_i32, %c16_i32 : i32
    %3 = vector.broadcast %2 : i32 to vector<1x256xi32>
    %4 = arith.remsi %0, %3 : vector<1x256xi32>
    %c0_i32_0 = arith.constant 0 : i32
    %5 = vector.broadcast %c0_i32_0 : i32 to vector<1x256xi32>
    %6 = arith.cmpi ne, %4, %5 : vector<1x256xi32>
    %c0_i32_1 = arith.constant 0 : i32
    %7 = vector.broadcast %c0_i32_1 : i32 to vector<1x256xi32>
    %8 = arith.cmpi slt, %4, %7 : vector<1x256xi32>
    %c0_i32_2 = arith.constant 0 : i32
    %9 = arith.cmpi slt, %2, %c0_i32_2 : i32
    %10 = vector.broadcast %9 : i1 to vector<1x256xi1>
    %11 = vector.broadcast %10 : vector<1x256xi1> to vector<1x256xi1>
    %12 = arith.xori %8, %11 : vector<1x256xi1>
    %13 = arith.andi %12, %6 : vector<1x256xi1>
    %14 = vector.broadcast %2 : i32 to vector<1x256xi32>
    %15 = arith.addi %4, %14 : vector<1x256xi32>
    %16 = arith.select %13, %15, %4 : vector<1x256xi1>, vector<1x256xi32>
    %c0_i32_3 = arith.constant 0 : i32
    %17 = vector.broadcast %c0_i32_3 : i32 to vector<1x256xi32>
    %18 = arith.cmpi ne, %16, %17 : vector<1x256xi32>
    %c15_i32 = arith.constant 15 : i32
    %19 = vector.broadcast %c15_i32 : i32 to vector<1x256xi32>
    %20 = arith.cmpi ne, %16, %19 : vector<1x256xi32>
    %cst = arith.constant 0.000000e+00 : f32
    %21 = vector.broadcast %cst : f32 to vector<8x17xf32>
    %c0 = arith.constant 0 : index
    %c0_4 = arith.constant 0 : index
    %c0_5 = arith.constant 0 : index
    %22 = vector.load %arg1[%c0, %c0_4, %c0_5] : memref<1x4x64xf32, #tpu.memory_space<vmem>>, vector<1x4x64xf32>
    %23 = vector.shape_cast %22 : vector<1x4x64xf32> to vector<4x64xf32>
    %c0_6 = arith.constant 0 : index
    %c0_7 = arith.constant 0 : index
    %24 = vector.load %arg3[%c0_6, %c0_7] : memref<64x256xf32, #tpu.memory_space<vmem>>, vector<64x256xf32>
    %cst_8 = arith.constant dense<0.000000e+00> : vector<4x256xf32>
    %25 = tpu.matmul %23, %24, %cst_8 {dimension_numbers = #tpu.dot_dimension_numbers<[1], [0], [0], [1], [0, 0, 1, 1], [], []>} : vector<4x64xf32>, vector<64x256xf32>, vector<4x256xf32> -> vector<4x256xf32>
    %c0_9 = arith.constant 0 : index
    %c0_10 = arith.constant 0 : index
    %c0_11 = arith.constant 0 : index
    %26 = vector.load %arg2[%c0_9, %c0_10, %c0_11] : memref<1x4x256xf32, #tpu.memory_space<vmem>>, vector<1x4x256xf32>
    %27 = vector.shape_cast %26 : vector<1x4x256xf32> to vector<4x256xf32>
    %28 = tpu.concatenate %25, %27 in 0 : vector<4x256xf32>, vector<4x256xf32> -> vector<8x256xf32>
    %29 = tpu.concatenate %21, %28, %21 in 1 : vector<8x17xf32>, vector<8x256xf32>, vector<8x17xf32> -> vector<8x290xf32>
    %30 = vector.extract_strided_slice %29 {offsets = [0, 0], sizes = [8, 256], strides = [1, 1]} : vector<8x290xf32> to vector<8x256xf32>
    %cst_12 = arith.constant 0.000000e+00 : f32
    %31 = vector.shape_cast %18 : vector<1x256xi1> to vector<1x256xi1>
    %32 = vector.broadcast %31 : vector<1x256xi1> to vector<8x256xi1>
    %33 = vector.broadcast %cst_12 : f32 to vector<8x256xf32>
    %34 = arith.select %32, %30, %33 : vector<8x256xi1>, vector<8x256xf32>
    %35 = vector.extract_strided_slice %29 {offsets = [0, 1], sizes = [8, 256], strides = [1, 1]} : vector<8x290xf32> to vector<8x256xf32>
    %36 = vector.extract_strided_slice %29 {offsets = [0, 2], sizes = [8, 256], strides = [1, 1]} : vector<8x290xf32> to vector<8x256xf32>
    %cst_13 = arith.constant 0.000000e+00 : f32
    %37 = vector.shape_cast %20 : vector<1x256xi1> to vector<1x256xi1>
    %38 = vector.broadcast %37 : vector<1x256xi1> to vector<8x256xi1>
    %39 = vector.broadcast %cst_13 : f32 to vector<8x256xf32>
    %40 = arith.select %38, %36, %39 : vector<8x256xi1>, vector<8x256xf32>
    %41 = vector.extract_strided_slice %29 {offsets = [0, 16], sizes = [8, 256], strides = [1, 1]} : vector<8x290xf32> to vector<8x256xf32>
    %cst_14 = arith.constant 0.000000e+00 : f32
    %42 = vector.shape_cast %18 : vector<1x256xi1> to vector<1x256xi1>
    %43 = vector.broadcast %42 : vector<1x256xi1> to vector<8x256xi1>
    %44 = vector.broadcast %cst_14 : f32 to vector<8x256xf32>
    %45 = arith.select %43, %41, %44 : vector<8x256xi1>, vector<8x256xf32>
    %46 = vector.extract_strided_slice %29 {offsets = [0, 17], sizes = [8, 256], strides = [1, 1]} : vector<8x290xf32> to vector<8x256xf32>
    %47 = vector.extract_strided_slice %29 {offsets = [0, 18], sizes = [8, 256], strides = [1, 1]} : vector<8x290xf32> to vector<8x256xf32>
    %cst_15 = arith.constant 0.000000e+00 : f32
    %48 = vector.shape_cast %20 : vector<1x256xi1> to vector<1x256xi1>
    %49 = vector.broadcast %48 : vector<1x256xi1> to vector<8x256xi1>
    %50 = vector.broadcast %cst_15 : f32 to vector<8x256xf32>
    %51 = arith.select %49, %47, %50 : vector<8x256xi1>, vector<8x256xf32>
    %52 = vector.extract_strided_slice %29 {offsets = [0, 32], sizes = [8, 256], strides = [1, 1]} : vector<8x290xf32> to vector<8x256xf32>
    %cst_16 = arith.constant 0.000000e+00 : f32
    %53 = vector.shape_cast %18 : vector<1x256xi1> to vector<1x256xi1>
    %54 = vector.broadcast %53 : vector<1x256xi1> to vector<8x256xi1>
    %55 = vector.broadcast %cst_16 : f32 to vector<8x256xf32>
    %56 = arith.select %54, %52, %55 : vector<8x256xi1>, vector<8x256xf32>
    %57 = vector.extract_strided_slice %29 {offsets = [0, 33], sizes = [8, 256], strides = [1, 1]} : vector<8x290xf32> to vector<8x256xf32>
    %58 = vector.extract_strided_slice %29 {offsets = [0, 34], sizes = [8, 256], strides = [1, 1]} : vector<8x290xf32> to vector<8x256xf32>
    %cst_17 = arith.constant 0.000000e+00 : f32
    %59 = vector.shape_cast %20 : vector<1x256xi1> to vector<1x256xi1>
    %60 = vector.broadcast %59 : vector<1x256xi1> to vector<8x256xi1>
    %61 = vector.broadcast %cst_17 : f32 to vector<8x256xf32>
    %62 = arith.select %60, %58, %61 : vector<8x256xi1>, vector<8x256xf32>
    %63 = tpu.concatenate %34, %35, %40, %45, %46, %51, %56, %57, %62 in 0 : vector<8x256xf32>, vector<8x256xf32>, vector<8x256xf32>, vector<8x256xf32>, vector<8x256xf32>, vector<8x256xf32>, vector<8x256xf32>, vector<8x256xf32>, vector<8x256xf32> -> vector<72x256xf32>
    %c0_18 = arith.constant 0 : index
    %c0_19 = arith.constant 0 : index
    %64 = vector.load %arg4[%c0_18, %c0_19] : memref<4x72xbf16, #tpu.memory_space<vmem>>, vector<4x72xbf16>
    %65 = arith.truncf %63 : vector<72x256xf32> to vector<72x256xbf16>
    %cst_20 = arith.constant dense<0.000000e+00> : vector<4x256xf32>
    %66 = tpu.matmul %64, %65, %cst_20 {dimension_numbers = #tpu.dot_dimension_numbers<[1], [0], [0], [1], [0, 0, 1, 1], [], []>} : vector<4x72xbf16>, vector<72x256xbf16>, vector<4x256xf32> -> vector<4x256xf32>
    %c0_21 = arith.constant 0 : index
    %c0_22 = arith.constant 0 : index
    %67 = vector.load %arg5[%c0_21, %c0_22] : memref<4x1xf32, #tpu.memory_space<vmem>>, vector<4x1xf32>
    %68 = vector.broadcast %67 : vector<4x1xf32> to vector<4x256xf32>
    %69 = arith.addf %66, %68 : vector<4x256xf32>
    %cst_23 = arith.constant 1.000000e-01 : f32
    %70 = vector.broadcast %cst_23 : f32 to vector<4x256xf32>
    %71 = arith.mulf %70, %69 : vector<4x256xf32>
    %72 = arith.maximumf %69, %71 : vector<4x256xf32>
    %c0_24 = arith.constant 0 : index
    %c0_25 = arith.constant 0 : index
    %c0_26 = arith.constant 0 : index
    %73 = vector.load %arg6[%c0_24, %c0_25, %c0_26] : memref<1x4x256xf32, #tpu.memory_space<vmem>>, vector<1x4x256xf32>
    %74 = vector.shape_cast %73 : vector<1x4x256xf32> to vector<4x256xf32>
    %75 = vector.shape_cast %72 : vector<4x256xf32> to vector<1x4x256xf32>
    tpu.vector_store %arg6[%c0_24, %c0_25, %c0_26], %75 {strides = array<i32>} : memref<1x4x256xf32, #tpu.memory_space<vmem>>, vector<1x4x256xf32>,
    return
  }
  func.func @transform_0(%arg0: i32) -> (i32, i32, i32) {
    %c0_i32 = arith.constant 0 : i32
    %c0_i32_0 = arith.constant 0 : i32
    %c0_i32_1 = arith.constant 0 : i32
    return %arg0, %c0_i32, %c0_i32_0 : i32, i32, i32
  }
  func.func @transform_1(%arg0: i32) -> (i32, i32, i32) {
    %c0_i32 = arith.constant 0 : i32
    %c0_i32_0 = arith.constant 0 : i32
    %c0_i32_1 = arith.constant 0 : i32
    return %arg0, %c0_i32, %c0_i32_0 : i32, i32, i32
  }
  func.func @transform_2(%arg0: i32) -> (i32, i32) {
    %c0_i32 = arith.constant 0 : i32
    %c0_i32_0 = arith.constant 0 : i32
    %c0_i32_1 = arith.constant 0 : i32
    return %c0_i32, %c0_i32_0 : i32, i32
  }
  func.func @transform_3(%arg0: i32) -> (i32, i32) {
    %c0_i32 = arith.constant 0 : i32
    %c0_i32_0 = arith.constant 0 : i32
    %c0_i32_1 = arith.constant 0 : i32
    return %c0_i32, %c0_i32_0 : i32, i32
  }
  func.func @transform_4(%arg0: i32) -> (i32, i32) {
    %c0_i32 = arith.constant 0 : i32
    %c0_i32_0 = arith.constant 0 : i32
    %c0_i32_1 = arith.constant 0 : i32
    return %c0_i32, %c0_i32_0 : i32, i32
  }
  func.func @transform_5(%arg0: i32) -> (i32, i32, i32) {
    %c0_i32 = arith.constant 0 : i32
    %c0_i32_0 = arith.constant 0 : i32
    %c0_i32_1 = arith.constant 0 : i32
    return %arg0, %c0_i32, %c0_i32_0 : i32, i32, i32
  }
}

</mosaic_0001>

<bundles_post_ra>
// kernel: up_light_forward.1
= control target key start
LH: loop header
LB: loop body
LE: loop exit
PB: predicated region body
PF: predicated region fallthrough
CT: control target
= control target key end

     0   :  { %s756_s18 = smov 0   ;;  %s918_s0 = inlined_call_operand.vmem [shape: f32[2,4,64], index: 0, kind: input, shape index: {}]   ;;  %s919_s1 = inlined_call_operand.vmem [shape: f32[2,4,256], index: 1, kind: input, shape index: {}]   ;;  %s920_s2 = inlined_call_operand.vmem [shape: f32[64,256], index: 2, kind: input, shape index: {}]   ;;  %s921_s3 = inlined_call_operand.vmem [shape: bf16[4,72], index: 3, kind: input, shape index: {}]   ;;  %s922_s4 = inlined_call_operand.vmem [shape: f32[4,1], index: 4, kind: input, shape index: {}]   ;;  %s923_s5 = inlined_call_operand.vmem [shape: f32[2,4,256], index: 5, kind: output, shape index: {}]  }
   0x1 LB: > { %s599_s19 = sadd.s32 4294967295, %s713_s18   ;;  %p603_p0 = scmp.ge.s32.totalorder %s713_s18, 1  ;;  %s713_s18 = sphi %s756_s18, %s15_s18  }
   0x2   : > { %p196_p1 = scmp.lt.s32.totalorder %s713_s18, 3 }
   0x4   : > { %p197_p2 = pnand %p603_p0, %p196_p1 }
   0x5   : > { %p228_p3 = scmp.lt.s32.totalorder (!%p197_p2), %s599_s19, 1  ;;  %s715_s13 = smov (!%p197_p2), 17  }
   0x6   : > { %200 = sbr.rel (%p197_p2) target bundleno = 575 (0x23f), region = 40  ;;  %s717_s15 = smov (!%p197_p2), 95  }
   0x7   : > { %s718_s16 = smov (!%p197_p2), 96   ;;  %s719_s17 = smov (!%p197_p2), 110  }
   0x8   : > { %s720_s20 = smov (!%p197_p2), 111   ;;  %s722_s22 = smov (!%p197_p2), 112  }
   0x9   : > { %s723_s23 = smov (!%p197_p2), 127  }
   0xb   : > { %v289_v0 = vld [vmem:[%s920_s2 + $0x70] sm:$0xff]  ;;  %v290_v1 = vld [vmem:[%s920_s2 + $0x78] sm:$0xff]  ;;  %v287_v2 = vld [vmem:[%s920_s2 + $0x60] sm:$0xff]  ;;  %s937_s19 = smov (!%p228_p3, %s599_s19), 1  ;;  %vm291_vm0 = vcmask 523264   ;;  %vm343_vm1 = vcmask 1043456   ;;  %v243_v32 = vlaneseq }
   0xc   : > { %303 = vmatpush.msra.mxu0 %v289_v0  ;;  %323 = vmatpush.msra.mxu1 %v290_v1  ;;  %v288_v3 = vld [vmem:[%s920_s2 + $0x68] sm:$0xff]  ;;  %v285_v4 = vld [vmem:[%s920_s2 + $0x50] sm:$0xff]  ;;  %v286_v5 = vld [vmem:[%s920_s2 + $0x58] sm:$0xff]  ;;  %s639_s11 = sshll.u32 %s937_s19, 3  ;;  %s604_s21 = sshll.u32 %s937_s19, 2  ;;  %vm352_vm2 = vcmask 138240  }
   0xd   : > { %v283_v6 = vld [vmem:[%s920_s2 + $0x40] sm:$0xff]  ;;  %v284_v7 = vld [vmem:[%s920_s2 + $0x48] sm:$0xff]  ;;  %s236_s14 = scalar_lea.vmem %s919_s1, %s639_s11  ;;  %v281_v8 = vld [vmem:[%s920_s2 + $0x30] sm:$0xff]  ;;  %s231_s7 = scalar_lea.vmem %s918_s0, %s604_s21  ;;  %v244_v33 = vand.u32 127, %v243_v32  ;;  %vm429_vm3 = vcmask 769024   ;;  %vm416_vm7 = vcmask 785408  }
   0xe   : > { %304 = vmatpush.msra.mxu0 %v287_v2  ;;  %324 = vmatpush.msra.mxu1 %v288_v3  ;;  %v282_v9 = vld [vmem:[%s920_s2 + $0x38] sm:$0xff]  ;;  %v335_v10 = vld [vmem:[%s236_s14] sm:$0xff]  ;;  %v280_v12 = vld [vmem:[%s920_s2 + $0x28] sm:$0xff]  ;;  %s716_s14 = smov 94   ;;  %s721_s21 = smov 126   ;;  %vm464_vm8 = vcmask 777216  }
   0xf   : > { %338 = vst [vmem:[#allocation1 + $0x1] ss:$2 sm:$0xff] %v335_v10  ;;  %v279_v11 = vld [vmem:[%s920_s2 + $0x20] sm:$0xff]  ;;  %v277_v13 = vld [vmem:[%s920_s2 + $0x10] sm:$0xff]  ;;  %v278_v14 = vld [vmem:[%s920_s2 + $0x18] sm:$0xff]  ;;  %v245_v35 = vadd.s32 128, %v244_v33  ;;  %s241_s30 = scalar_lea.vmem %s923_s5, %s639_s11 }
  0x10   : > { %305 = vmatpush.msra.mxu0 %v285_v4  ;;  %325 = vmatpush.msra.mxu1 %v286_v5  ;;  %v275_v15 = vld [vmem:[%s920_s2] sm:$0xff]  ;;  %v276_v16 = vld [vmem:[%s920_s2 + $0x8] sm:$0xff]  ;;  %v250_v36 = vand.u32 15, %v244_v33  ;;  %vm724_vm10 = vmmov 1   ;;  %vm403_vm13 = vcmask 900096   ;;  %vm453_vm14 = vcmask 908288  }
  0x11   : > { %v274_v17 = vld [vmem:[%s231_s7] sm:$0xf]  ;;  %v257_v37 = vand.u32 15, %v245_v35  ;;  %v725_v10 = vmov 0  }
  0x12   : > { %306 = vmatpush.msra.mxu0 %v283_v6  ;;  %326 = vmatpush.msra.mxu1 %v284_v7  ;;  %vm839_vm4 = vcmp.ne.s32.totalorder %v250_v36, 15  ;;  %vm851_vm6 = vcmp.ne.s32.totalorder %v250_v36, 0  ;;  %v469_v43 = vld [vmem:[%s921_s3] sm:$0x3] }
  0x13   : > { %vm843_vm5 = vcmp.ne.s32.totalorder %v257_v37, 15  ;;  %vm855_vm9 = vcmp.ne.s32.totalorder %v257_v37, 0  ;;  %vm864_vm11 = vmpackc.low %vm724_vm10, %vm851_vm6  ;;  %705 = vset.pattern.permute.xlu2 %v725_v10  ;;  %706 = vset.pattern.permute.xlu0 %v725_v10 }
  0x14   : > { %307 = vmatpush.msra.mxu0 %v281_v8  ;;  %327 = vmatpush.msra.mxu1 %v282_v9  ;;  %vm871_vm12 = vmpackc.low %vm724_vm10, %vm855_vm9  ;;  %v480_v8 = vld [vmem:[%s922_s4] sm:$0xf] }
  0x15   : > { %vm627_vm15 = vmpackc.low %vm843_vm5, %vm724_vm10 }
  0x16   : > { %308 = vmatpush.msra.mxu0 %v279_v11  ;;  %328 = vmatpush.msra.mxu1 %v280_v12  ;;  %v339_v18 = vld.sshfl [vmem:[#allocation1] sm:$0xff pattern:$0x75316420]  ;;  %v340_v19 = vld.sshfl [vmem:[#allocation1 + $0x8] sm:$0xff pattern:$0x75316420] }
  0x18   : > { %309 = vmatpush.msra.mxu0 %v277_v13  ;;  %329 = vmatpush.msra.mxu1 %v278_v14 }
  0x1a   : > { %310 = vmatpush.msra.mxu0 %v275_v15  ;;  %330 = vmatpush.msra.mxu1 %v276_v16 }
  0x1b   : > { %609 = vmatmul.msk.f32.vlgmr.msra.gmra.mxu0 %vm291_vm0, %v274_v17  ;;  %610 = vmatmul.msk.f32.vlgmr.msra.gmra.mxu1 %vm291_vm0, %v274_v17  ;;  %vm614_vm0 = vmpackc.low %vm839_vm4, %vm724_vm10  ;;  %vm442_vm10 = vcmask 1039360  }
  0x98   : > { %v312_v20 = vpop.f32.mrf.mxu0  ;;  %v332_v21 = vpop.f32.mrf.mxu1 }
  0x99   : > { %v344_v22 = vsel %vm343_vm1, %v312_v20, %v339_v18  ;;  %v345_v23 = vsel %vm343_vm1, %v332_v21, %v340_v19 }
  0x9a   : > { %v660_v24 = vpack.i.bf16 %v345_v23, %v344_v22 }
  0x9c   : > { %661 = vrot.lane.b32.xlu0 %v660_v24, %s715_s13 }
 0x10e   : > { %v662_v25 = vpop.permute.xlu0 %661 }
 0x10f   : > { %v664_v26 = vunpack.i.h.bf16 %v662_v25  ;;  %v663_v27 = vunpack.i.l.bf16 %v662_v25 }
 0x111   : > { %v358_v28 = vsel %vm352_vm2, %v664_v26, 0.0  ;;  %v826_v29 = vsel %vm352_vm2, %v663_v27, %v664_v26  ;;  %v828_v30 = vsel %vm352_vm2, 0.0, %v663_v27  ;;  %vm377_vm2 = vcmask 1031168  }
 0x112   : > { %423 = vrot.lane.b32.xlu1 %v828_v30, %s716_s14  ;;  %v675_v31 = vpack.i.bf16 %v358_v28, %v826_v29 }
 0x114   : > { %676 = vrot.lane.b32.xlu2 %v675_v31, %s717_s15  ;;  %666 = vrot.lane.b32.xlu0 %v675_v31, %s716_s14 }
 0x11a   : > { %671 = vrot.lane.b32.xlu1 %v675_v31, %s718_s16 }
 0x11c   : > { %410 = vrot.lane.b32.xlu2 %v828_v30, %s718_s16  ;;  %458 = vrot.lane.b32.xlu0 %v828_v30, %s717_s15 }
 0x122   : > { %681 = vrot.lane.b32.xlu1 %v675_v31, %s719_s17 }
 0x124   : > { %686 = vrot.lane.b32.xlu2 %v675_v31, %s720_s20  ;;  %397 = vrot.lane.b32.xlu0 %v828_v30, %s719_s17 }
 0x12a   : > { %447 = vrot.lane.b32.xlu1 %v828_v30, %s720_s20 }
 0x12c   : > { %691 = vrot.lane.b32.xlu2 %v675_v31, %s721_s21  ;;  %696 = vrot.lane.b32.xlu0 %v675_v31, %s722_s22 }
 0x132   : > { %371 = vrot.lane.b32.xlu1 %v828_v30, %s721_s21 }
 0x134   : > { %384 = vrot.lane.b32.xlu2 %v828_v30, %s722_s22  ;;  %701 = vrot.lane.b32.xlu0 %v675_v31, %s723_s23 }
 0x13a   : > { %436 = vrot.lane.b32.xlu1 %v828_v30, %s723_s23 }
 0x13c   : > { %483 = vperm.xlu2 %705, %v480_v8  }
 0x16e   : > { %v677_v34 = vpop.permute.xlu2 %676 }
 0x16f   : > { %v679_v47 = vunpack.i.h.bf16 %v677_v34  ;;  %v678_v48 = vunpack.i.l.bf16 %v677_v34 }
 0x171   : > { %v466_v1 = vsel %vm464_vm8, %v678_v48, %v679_v47 }
 0x176   : > { %v411_v39 = vpop.permute.xlu2 %410 }
 0x17e   : > { %v687_v3 = vpop.permute.xlu2 %686 }
 0x17f   : > { %v689_v6 = vunpack.i.h.bf16 %v687_v3  ;;  %v688_v7 = vunpack.i.l.bf16 %v687_v3 }
 0x181   : > { %v455_v15 = vsel %vm453_vm14, %v688_v7, %v689_v6 }
 0x184   : > { %v424_v38 = vpop.permute.xlu1 %423 }
 0x186   : > { %v667_v40 = vpop.permute.xlu0 %666  ;;  %v692_v17 = vpop.permute.xlu2 %691 }
 0x187   : > { %v669_v41 = vunpack.i.h.bf16 %v667_v40  ;;  %v668_v42 = vunpack.i.l.bf16 %v667_v40  ;;  %v694_v19 = vunpack.i.h.bf16 %v692_v17  ;;  %v693_v20 = vunpack.i.l.bf16 %v692_v17 }
 0x189   : > { %v430_v45 = vsel %vm429_vm3, %v424_v38, %v668_v42  ;;  %v431_v46 = vsel %vm429_vm3, %v668_v42, %v669_v41  ;;  %vm390_vm3 = vcmask 916480   ;;  %v379_v27 = vsel %vm377_vm2, %v693_v20, %v694_v19 }
 0x18a   : > { %v434_v49 = vsel %vm839_vm4, %v430_v45, 0.0  ;;  %v435_v50 = vsel %vm843_vm5, %v431_v46, 0.0 }
 0x18b   : > { %v478_v51 = vpack.c.bf16 %v434_v49, %v434_v49  ;;  %v479_v52 = vpack.c.bf16 %v435_v50, %v435_v50 }
 0x18c   : > { %v672_v54 = vpop.permute.xlu1 %671 }
 0x18d   : > { %v674_v56 = vunpack.i.h.bf16 %v672_v54  ;;  %v673_v57 = vunpack.i.l.bf16 %v672_v54  ;;  %v491_v58 = vsel %vm343_vm1, %v478_v51, 0  ;;  %v494_v59 = vsel %vm343_vm1, %v479_v52, 0 }
 0x18e   : > { %v459_v60 = vpop.permute.xlu0 %458  ;;  %499 = vmatpush.bf16.msra.mxu2 %v491_v58  ;;  %512 = vmatpush.bf16.msra.mxu3 %v494_v59  ;;  %v385_v32 = vpop.permute.xlu2 %384 }
 0x18f   : > { %v417_v62 = vsel %vm416_vm7, %v411_v39, %v673_v57  ;;  %v465_v63 = vsel %vm464_vm8, %v459_v60, %v678_v48  ;;  %v418_v0 = vsel %vm416_vm7, %v673_v57, %v674_v56  ;;  %vm630_vm7 = vmpackc.low %vm855_vm9, %vm843_vm5  ;;  %vm486_vm5 = vcmask 588800  }
 0x190   : > { %v612_v4 = vpack.c.bf16 %v465_v63, %v417_v62  ;;  %v625_v5 = vpack.c.bf16 %v466_v1, %v418_v0  ;;  %vm617_vm8 = vmpackc.low %vm851_vm6, %vm839_vm4 }
 0x192   : > { %613 = vmatpush.bf16.msk.msra.mxu2 %vm864_vm11, %v612_v4  ;;  %626 = vmatpush.bf16.msk.msra.mxu3 %vm871_vm12, %v625_v5 }
 0x194   : > { %v682_v9 = vpop.permute.xlu1 %681 }
 0x195   : > { %v684_v11 = vunpack.i.h.bf16 %v682_v9  ;;  %v683_v12 = vunpack.i.l.bf16 %v682_v9 }
 0x196   : > { %v398_v13 = vpop.permute.xlu0 %397  ;;  %v484_v46 = vpop.permute.xlu2 %483 }
 0x197   : > { %v405_v14 = vsel %vm403_vm13, %v683_v12, %v684_v11  ;;  %v404_v21 = vsel %vm403_vm13, %v398_v13, %v683_v12 }
 0x198   : > { %v628_v16 = vpack.c.bf16 %v405_v14, %v455_v15 }
 0x19a   : > { %629 = vmatpush.bf16.msk.msra.mxu3 %vm627_vm15, %v628_v16 }
 0x19c   : > { %v448_v18 = vpop.permute.xlu1 %447 }
 0x19d   : > { %v454_v22 = vsel %vm453_vm14, %v448_v18, %v688_v7 }
 0x19e   : > { %v615_v23 = vpack.c.bf16 %v404_v21, %v454_v22  ;;  %v697_v24 = vpop.permute.xlu0 %696 }
 0x19f   : > { %v699_v25 = vunpack.i.h.bf16 %v697_v24  ;;  %v698_v26 = vunpack.i.l.bf16 %v697_v24 }
 0x1a0   : > { %616 = vmatpush.bf16.msk.msra.mxu2 %vm614_vm0, %v615_v23 }
 0x1a1   : > { %v392_v28 = vsel %vm390_vm3, %v698_v26, %v699_v25  ;;  %v391_v35 = vsel %vm390_vm3, %v385_v32, %v698_v26 }
 0x1a2   : > { %v631_v31 = vpack.c.bf16 %v392_v28, %v379_v27 }
 0x1a4   : > { %v372_v33 = vpop.permute.xlu1 %371  ;;  %632 = vmatpush.bf16.msk.msra.mxu3 %vm630_vm7, %v631_v31 }
 0x1a5   : > { %v378_v34 = vsel %vm377_vm2, %v372_v33, %v693_v20 }
 0x1a6   : > { %v618_v36 = vpack.c.bf16 %v391_v35, %v378_v34  ;;  %v702_v37 = vpop.permute.xlu0 %701 }
 0x1a7   : > { %v704_v38 = vunpack.i.h.bf16 %v702_v37  ;;  %v703_v39 = vunpack.i.l.bf16 %v702_v37 }
 0x1a8   : > { %619 = vmatpush.bf16.msk.msra.mxu2 %vm617_vm8, %v618_v36 }
 0x1a9   : > { %v444_v40 = vsel %vm442_vm10, %v703_v39, %v704_v38 }
 0x1aa   : > { %v634_v41 = vpack.c.bf16 %v444_v40, %v826_v29 }
 0x1ac   : > { %v437_v42 = vpop.permute.xlu1 %436  ;;  %635 = vmatpush.bf16.msk.msra.mxu3 %vm871_vm12, %v634_v41 }
 0x1ad   : > { %v443_v44 = vsel %vm442_vm10, %v437_v42, %v703_v39 }
 0x1ae   : > { %v621_v45 = vpack.c.bf16 %v443_v44, %v828_v30 }
 0x1af   : > { %636 = vmatmul.msk.bf16.vlgmr.msra.gmra.mxu3 %vm486_vm5, %v469_v43 }
 0x1b0   : > { %622 = vmatpush.bf16.msk.msra.mxu2 %vm864_vm11, %v621_v45 }
 0x1b3   : > { %623 = vmatmul.msk.bf16.vlgmr.msra.gmra.mxu2 %vm486_vm5, %v469_v43 }
 0x232   : > { %v518_v29 = vpop.f32.mrf.mxu3 }
 0x233   : > { %v519_v47 = vadd.f32 %v518_v29, %v484_v46 }
 0x235   : > { %v523_v48 = vmul.f32 0.1, %v519_v47 }
 0x236   : > { %v505_v49 = vpop.f32.mrf.mxu2 }
 0x237   : > { %v525_v50 = vmax.f32 %v519_v47, %v523_v48  ;;  %v506_v51 = vadd.f32 %v505_v49, %v484_v46 }
 0x239   : > { %v522_v52 = vmul.f32 0.1, %v506_v51  ;;  %v528_v30 = vrot.slane %v525_v50, 4 }
 0x23a   : > { %v520_v53 = vpop.f32.mrf.mxu3 }
 0x23b   : > { %v524_v54 = vmax.f32 %v506_v51, %v522_v52 }
 0x23d   : > { %v529_v55 = vsel %vm343_vm1, %v524_v54, %v528_v30 }
 0x23e   : > { %531 = vst [vmem:[%s241_s30] sm:$0xff] %v529_v55  ;;  %v507_v56 = vpop.f32.mrf.mxu2 }
 0x23f PF: > { %s15_s18 = sadd.s32 1, %s713_s18  }
 0x240   : > { %p12_p4 = scmp.ge.s32.totalorder %s15_s18, 4  }
 0x242   :  { %14 = sbr.rel (!%p12_p4) target bundleno = 1 (0x1), region = 74 }

</bundles_post_ra>
